<compile_context>
chip_gen: v5e
topology: v5e:2x2
jax: 0.10.0
libtpu: 0.0.40
codegen_flags: <defaults>
</compile_context>

<pallas_src>
import jax
import jax.numpy as jnp
from jax.experimental import pallas as pl
from jax.experimental.pallas import tpu as pltpu

_EPS = 1e-5  # torch.nn.InstanceNorm2d default eps


# ----------------------------- kernel --------------------------------------- #

def _adain_kernel(code_ref, wg_ref, bg_ref, wb_ref, bb_ref, x_ref, o_ref):
    # code: (1, 1, code_dim)   -- this batch sample's style code
    # wg/wb: (c_tile, code_dim), bg/bb: (c_tile, 1)  -- fc weights for this tile
    # x:    (1, c_tile, HW)    -- full spatial extent on the lane axis

    # Fused style projection:  gamma[c] = <w_g[c,:], code> + b_g[c]  (same for beta).
    # Broadcast-multiply + lane reduction; negligible cost, hidden under the
    # HBM-bound x stream (the MXU-shaped standalone fc kernel was pure overhead).
    code_row = code_ref[0].astype(jnp.float32)                       # (1, code_dim)
    wg = wg_ref[...].astype(jnp.float32)                             # (c_tile, code_dim)
    wb = wb_ref[...].astype(jnp.float32)
    gamma = jnp.sum(wg * code_row, axis=-1, keepdims=True) + bg_ref[...].astype(jnp.float32)
    beta = jnp.sum(wb * code_row, axis=-1, keepdims=True) + bb_ref[...].astype(jnp.float32)

    # Instance-norm statistics in a single traversal of the block:
    #   var = E[x^2] - E[x]^2   (biased variance, matching InstanceNorm2d).
    x = x_ref[...].astype(jnp.float32)                               # (1, c_tile, HW)
    inv_hw = 1.0 / x.shape[-1]
    mean = jnp.sum(x, axis=-1, keepdims=True) * inv_hw               # (1, c_tile, 1)
    ex2 = jnp.sum(x * x, axis=-1, keepdims=True) * inv_hw
    var = jnp.maximum(ex2 - mean * mean, 0.0)                        # guard fp cancellation
    inv_std = jax.lax.rsqrt(var + _EPS)

    # out = (1 + gamma) * (x - mean) * inv_std + beta  ==  x * scale + shift
    scale = (1.0 + gamma[None]) * inv_std                            # (1, c_tile, 1)
    shift = beta[None] - mean * scale
    o_ref[...] = (x * scale + shift).astype(o_ref.dtype)


# ----------------------------- tiling helpers -------------------------------- #

def _vmem_capacity_bytes():
    """Generation-aware VMEM query (v5e/v6e: 128 MiB, v7x: 64 MiB per TC)."""
    try:
        return int(pltpu.get_tpu_info().vmem_capacity_bytes)
    except Exception:
        return 64 << 20  # conservative default (v7x per-TensorCore)


def _pick_channel_tile(ch, hw, itemsize, n, pipeline_budget_bytes):
    """Largest divisor of `ch` (multiple of the dtype's sublane-packing count)
    whose total pipeline footprint fits the budget.

    Per-channel-row cost = 2x input + 2x output double-buffers (native dtype)
    + ~3 full-size f32 intermediates from the in-kernel upcast / x*x / output.
    """
    per_row = hw * (4 * itemsize + 3 * 4)
    # Sub-32-bit dtypes pack 2-4 rows per sublane; keep tiles a multiple of the
    # packed count so DMAs stay unmasked.
    mult = {4: 8, 2: 16, 1: 32}.get(itemsize, 8)
    if ch % mult != 0:
        # Full-channel block is always layout-legal.
        # TODO(synk): if ch*per_row exceeds VMEM here, a spatially-tiled
        # two-pass (stats + normalize) fallback would be required.
        return ch
    # Keep >= 2 grid points so both v7x TensorCores have work even when n == 1.
    max_tile = ch if n >= 2 else max(mult, ch // 2)
    best = mult
    t = mult
    while t <= ch:
        if ch % t == 0 and t <= max_tile and t * per_row <= pipeline_budget_bytes:
            best = t
        t += mult
    return best


# ----------------------------- wrapper --------------------------------------- #

def adain_forward(x, code, params):
    """AdaIN: (1 + gamma) * InstanceNorm(x) + beta, (gamma, beta) = chunk(fc(code))."""
    n, ch, h, w = x.shape
    hw = h * w
    code_dim = code.shape[1]
    w_t, b = params["w_t"], params["b"]            # (code_dim, 2*ch), (1, 2*ch)

    # Once-per-call layout plumbing (tiny): split fc weights into kernel-friendly
    # gamma/beta halves; put H*W on the lane axis of x.
    w_g = w_t[:, :ch].T                            # (ch, code_dim)
    w_b = w_t[:, ch:].T                            # (ch, code_dim)
    b_g = b[0, :ch].reshape(ch, 1)
    b_b = b[0, ch:].reshape(ch, 1)
    code3 = code.reshape(n, 1, code_dim)
    x_k = x.reshape(n, ch, hw)

    # Generation-aware VMEM budgeting.
    vmem_cap = _vmem_capacity_bytes()
    vmem_limit = min(96 << 20, max(32 << 20, vmem_cap - (16 << 20)))
    pipeline_budget = min(40 << 20, vmem_limit - (8 << 20))

    c_tile = _pick_channel_tile(ch, hw, x.dtype.itemsize, n, pipeline_budget)
    grid = (n, ch // c_tile)

    out = pl.pallas_call(
        _adain_kernel,
        out_shape=jax.ShapeDtypeStruct((n, ch, hw), x.dtype),
        grid=grid,
        in_specs=[
            pl.BlockSpec((1, 1, code_dim), lambda i, j: (i, 0, 0)),    # code (per batch)
            pl.BlockSpec((c_tile, code_dim), lambda i, j: (j, 0)),     # w_gamma tile
            pl.BlockSpec((c_tile, 1), lambda i, j: (j, 0)),            # b_gamma tile
            pl.BlockSpec((c_tile, code_dim), lambda i, j: (j, 0)),     # w_beta tile
            pl.BlockSpec((c_tile, 1), lambda i, j: (j, 0)),            # b_beta tile
            pl.BlockSpec((1, c_tile, hw), lambda i, j: (i, j, 0)),     # x tile
        ],
        out_specs=pl.BlockSpec((1, c_tile, hw), lambda i, j: (i, j, 0)),
        compiler_params=pltpu.CompilerParams(
            dimension_semantics=("parallel", "parallel"),
            vmem_limit_bytes=int(vmem_limit)),
    )(code3, w_g, b_g, w_b, b_b, x_k)

    return out.reshape(n, ch, h, w)


# ----------------------------- params & reference ---------------------------- #

def make_params(key, *, code_dim, num_features):
    """nn.Linear(code_dim, 2*num_features): stored pre-transposed (w_t = weight.T)."""
    k1, k2 = jax.random.split(key)
    bound = 1.0 / jnp.sqrt(code_dim)
    w_t = jax.random.uniform(k1, (code_dim, 2 * num_features), jnp.float32, -bound, bound)
    b = jax.random.uniform(k2, (1, 2 * num_features), jnp.float32, -bound, bound)
    return {"w_t": w_t, "b": b}


def adain_reference(x, code, params):
    """Pure-JAX reference mirroring the PyTorch AdaIN.forward."""
    h = code @ params["w_t"] + params["b"]          # (N, 2C)
    ch = x.shape[1]
    gamma = h[:, :ch][:, :, None, None]
    beta = h[:, ch:][:, :, None, None]
    mean = x.mean(axis=(2, 3), keepdims=True)
    var = x.var(axis=(2, 3), keepdims=True)         # biased, like InstanceNorm2d
    x_hat = (x - mean) / jnp.sqrt(var + _EPS)
    return (1.0 + gamma) * x_hat + beta


# ----------------------------- demo ------------------------------------------ #

if __name__ == "__main__":
    key = jax.random.PRNGKey(0)
    N, C, H, W = 2, 4, 16, 16
    CODE_DIM = 64

    kx, kc, kp = jax.random.split(key, 3)
    x = jax.random.normal(kx, (N, C, H, W), jnp.float32)
    code = jax.random.normal(kc, (N, CODE_DIM), jnp.float32)
    params = make_params(kp, code_dim=CODE_DIM, num_features=C)

    out = adain_forward(x, code, params)
    out = jax.block_until_ready(out)

    ref = adain_reference(x, code, params)
    assert out.shape == x.shape
    assert jnp.allclose(out, ref, atol=1e-4, rtol=1e-4), "mismatch vs reference"

    print("KERNEL_OK")
</pallas_src>

<mosaic_0001>
module attributes {stable_mosaic.version = 11 : i64} {
  func.func @_adain_kernel(%arg0: i32, %arg1: i32, %arg2: memref<1x1x64xf32, #tpu.memory_space<vmem>>, %arg3: memref<4x64xf32, #tpu.memory_space<vmem>>, %arg4: memref<4x1xf32, #tpu.memory_space<vmem>>, %arg5: memref<4x64xf32, #tpu.memory_space<vmem>>, %arg6: memref<4x1xf32, #tpu.memory_space<vmem>>, %arg7: memref<1x4x256xf32, #tpu.memory_space<vmem>>, %arg8: memref<1x4x256xf32, #tpu.memory_space<vmem>>) attributes {dimension_semantics = [#tpu.dimension_semantics<parallel>, #tpu.dimension_semantics<parallel>], iteration_bounds = array<i64: 2, 1>, scalar_prefetch = 0 : i64, scratch_operands = 0 : i64, tpu.core_type = #tpu.core_type<tc>, window_params = [{transform_indices = @transform_0, window_bounds = array<i64: 1, 1, 64>}, {transform_indices = @transform_1, window_bounds = array<i64: 4, 64>}, {transform_indices = @transform_2, window_bounds = array<i64: 4, 1>}, {transform_indices = @transform_3, window_bounds = array<i64: 4, 64>}, {transform_indices = @transform_4, window_bounds = array<i64: 4, 1>}, {transform_indices = @transform_5, window_bounds = array<i64: 1, 4, 256>}, {transform_indices = @transform_6, window_bounds = array<i64: 1, 4, 256>}]} {
    %c0 = arith.constant 0 : index
    %c0_0 = arith.constant 0 : index
    %c0_1 = arith.constant 0 : index
    %0 = vector.load %arg2[%c0, %c0_0, %c0_1] : memref<1x1x64xf32, #tpu.memory_space<vmem>>, vector<1x1x64xf32>
    %1 = vector.shape_cast %0 : vector<1x1x64xf32> to vector<1x64xf32>
    %c0_2 = arith.constant 0 : index
    %c0_3 = arith.constant 0 : index
    %2 = vector.load %arg3[%c0_2, %c0_3] : memref<4x64xf32, #tpu.memory_space<vmem>>, vector<4x64xf32>
    %c0_4 = arith.constant 0 : index
    %c0_5 = arith.constant 0 : index
    %3 = vector.load %arg5[%c0_4, %c0_5] : memref<4x64xf32, #tpu.memory_space<vmem>>, vector<4x64xf32>
    %4 = vector.broadcast %1 : vector<1x64xf32> to vector<4x64xf32>
    %5 = arith.mulf %2, %4 : vector<4x64xf32>
    %cst = arith.constant dense<0.000000e+00> : vector<4xf32>
    %6 = vector.multi_reduction <add>, %5, %cst [1] : vector<4x64xf32> to vector<4xf32>
    %7 = vector.shape_cast %6 : vector<4xf32> to vector<4x1xf32>
    %c0_6 = arith.constant 0 : index
    %c0_7 = arith.constant 0 : index
    %8 = vector.load %arg4[%c0_6, %c0_7] : memref<4x1xf32, #tpu.memory_space<vmem>>, vector<4x1xf32>
    %9 = arith.addf %7, %8 : vector<4x1xf32>
    %10 = vector.broadcast %1 : vector<1x64xf32> to vector<4x64xf32>
    %11 = arith.mulf %3, %10 : vector<4x64xf32>
    %cst_8 = arith.constant dense<0.000000e+00> : vector<4xf32>
    %12 = vector.multi_reduction <add>, %11, %cst_8 [1] : vector<4x64xf32> to vector<4xf32>
    %13 = vector.shape_cast %12 : vector<4xf32> to vector<4x1xf32>
    %c0_9 = arith.constant 0 : index
    %c0_10 = arith.constant 0 : index
    %14 = vector.load %arg6[%c0_9, %c0_10] : memref<4x1xf32, #tpu.memory_space<vmem>>, vector<4x1xf32>
    %15 = arith.addf %13, %14 : vector<4x1xf32>
    %c0_11 = arith.constant 0 : index
    %c0_12 = arith.constant 0 : index
    %c0_13 = arith.constant 0 : index
    %16 = vector.load %arg7[%c0_11, %c0_12, %c0_13] : memref<1x4x256xf32, #tpu.memory_space<vmem>>, vector<1x4x256xf32>
    %cst_14 = arith.constant dense<0.000000e+00> : vector<1x4xf32>
    %17 = vector.multi_reduction <add>, %16, %cst_14 [2] : vector<1x4x256xf32> to vector<1x4xf32>
    %18 = vector.shape_cast %17 : vector<1x4xf32> to vector<1x4x1xf32>
    %cst_15 = arith.constant 3.906250e-03 : f32
    %19 = vector.broadcast %cst_15 : f32 to vector<1x4x1xf32>
    %20 = arith.mulf %18, %19 : vector<1x4x1xf32>
    %21 = arith.mulf %16, %16 : vector<1x4x256xf32>
    %cst_16 = arith.constant dense<0.000000e+00> : vector<1x4xf32>
    %22 = vector.multi_reduction <add>, %21, %cst_16 [2] : vector<1x4x256xf32> to vector<1x4xf32>
    %23 = vector.shape_cast %22 : vector<1x4xf32> to vector<1x4x1xf32>
    %cst_17 = arith.constant 3.906250e-03 : f32
    %24 = vector.broadcast %cst_17 : f32 to vector<1x4x1xf32>
    %25 = arith.mulf %23, %24 : vector<1x4x1xf32>
    %26 = arith.mulf %20, %20 : vector<1x4x1xf32>
    %27 = arith.subf %25, %26 : vector<1x4x1xf32>
    %cst_18 = arith.constant 0.000000e+00 : f32
    %28 = vector.broadcast %cst_18 : f32 to vector<1x4x1xf32>
    %29 = arith.maximumf %27, %28 : vector<1x4x1xf32>
    %cst_19 = arith.constant 9.99999974E-6 : f32
    %30 = vector.broadcast %cst_19 : f32 to vector<1x4x1xf32>
    %31 = arith.addf %29, %30 : vector<1x4x1xf32>
    %32 = math.rsqrt %31 : vector<1x4x1xf32>
    %33 = vector.shape_cast %9 : vector<4x1xf32> to vector<1x4x1xf32>
    %cst_20 = arith.constant 1.000000e+00 : f32
    %34 = vector.broadcast %cst_20 : f32 to vector<1x4x1xf32>
    %35 = arith.addf %34, %33 : vector<1x4x1xf32>
    %36 = arith.mulf %35, %32 : vector<1x4x1xf32>
    %37 = vector.shape_cast %15 : vector<4x1xf32> to vector<1x4x1xf32>
    %38 = arith.mulf %20, %36 : vector<1x4x1xf32>
    %39 = arith.subf %37, %38 : vector<1x4x1xf32>
    %40 = vector.broadcast %36 : vector<1x4x1xf32> to vector<1x4x256xf32>
    %41 = arith.mulf %16, %40 : vector<1x4x256xf32>
    %42 = vector.broadcast %39 : vector<1x4x1xf32> to vector<1x4x256xf32>
    %43 = arith.addf %41, %42 : vector<1x4x256xf32>
    %c0_21 = arith.constant 0 : index
    %c0_22 = arith.constant 0 : index
    %c0_23 = arith.constant 0 : index
    %44 = vector.load %arg8[%c0_21, %c0_22, %c0_23] : memref<1x4x256xf32, #tpu.memory_space<vmem>>, vector<1x4x256xf32>
    tpu.vector_store %arg8[%c0_21, %c0_22, %c0_23], %43 {strides = array<i32>} : memref<1x4x256xf32, #tpu.memory_space<vmem>>, vector<1x4x256xf32>,
    return
  }
  func.func @transform_0(%arg0: i32, %arg1: i32) -> (i32, i32, i32) {
    %c0_i32 = arith.constant 0 : i32
    %c0_i32_0 = arith.constant 0 : i32
    %c0_i32_1 = arith.constant 0 : i32
    return %arg0, %c0_i32, %c0_i32_0 : i32, i32, i32
  }
  func.func @transform_1(%arg0: i32, %arg1: i32) -> (i32, i32) {
    %c0_i32 = arith.constant 0 : i32
    %c0_i32_0 = arith.constant 0 : i32
    return %arg1, %c0_i32 : i32, i32
  }
  func.func @transform_2(%arg0: i32, %arg1: i32) -> (i32, i32) {
    %c0_i32 = arith.constant 0 : i32
    %c0_i32_0 = arith.constant 0 : i32
    return %arg1, %c0_i32 : i32, i32
  }
  func.func @transform_3(%arg0: i32, %arg1: i32) -> (i32, i32) {
    %c0_i32 = arith.constant 0 : i32
    %c0_i32_0 = arith.constant 0 : i32
    return %arg1, %c0_i32 : i32, i32
  }
  func.func @transform_4(%arg0: i32, %arg1: i32) -> (i32, i32) {
    %c0_i32 = arith.constant 0 : i32
    %c0_i32_0 = arith.constant 0 : i32
    return %arg1, %c0_i32 : i32, i32
  }
  func.func @transform_5(%arg0: i32, %arg1: i32) -> (i32, i32, i32) {
    %c0_i32 = arith.constant 0 : i32
    %c0_i32_0 = arith.constant 0 : i32
    return %arg0, %arg1, %c0_i32 : i32, i32, i32
  }
  func.func @transform_6(%arg0: i32, %arg1: i32) -> (i32, i32, i32) {
    %c0_i32 = arith.constant 0 : i32
    %c0_i32_0 = arith.constant 0 : i32
    return %arg0, %arg1, %c0_i32 : i32, i32, i32
  }
}

</mosaic_0001>

<bundles_post_ra>
// kernel: tpu_custom_call.1
= control target key start
LH: loop header
LB: loop body
LE: loop exit
PB: predicated region body
PF: predicated region fallthrough
CT: control target
= control target key end

     0   :  { %s1098_s0 = inlined_call_operand.hbm [shape: f32[2,1,64], index: 0, kind: input, shape index: {}]   ;;  %s1099_s1 = inlined_call_operand.vmem [shape: f32[4,64], index: 1, kind: input, shape index: {}]   ;;  %s1100_s2 = inlined_call_operand.vmem [shape: f32[4,1], index: 2, kind: input, shape index: {}]   ;;  %s1101_s3 = inlined_call_operand.vmem [shape: f32[4,64], index: 3, kind: input, shape index: {}]   ;;  %s1102_s4 = inlined_call_operand.vmem [shape: f32[4,1], index: 4, kind: input, shape index: {}]   ;;  %s1103_s5 = inlined_call_operand.hbm [shape: f32[2,4,256], index: 5, kind: input, shape index: {}]   ;;  %s1104_s6 = inlined_call_operand.hbm [shape: f32[2,4,256], index: 6, kind: output, shape index: {}]  }
   0x1   :  { %1106 = sst [smem:[#allocation12_spill]] %s1098_s0 }
   0x2   :  { %11 = vsyncpa [#allocation3], 0 }
   0x3   :  { %13 = vsyncpa [#allocation3 + $0x1], 0 }
   0x4   :  { %14 = vsyncpa [#allocation6], 0 }
   0x5   :  { %16 = vsyncpa [#allocation6 + $0x1], 0 }
   0x6   :  { %17 = vsyncpa [#allocation4], 0 }
   0x7   :  { %19 = vsyncpa [#allocation4 + $0x1], 0  ;;  %s938_s21 = smov 0   ;;  %s940_s22 = smov 0  }
   0x8   :  { %s942_s23 = smov 0   ;;  %s944_s24 = smov 0  }
   0x9   :  { %s946_s25 = smov 0   ;;  %s948_s26 = smov 0  }
   0xa LB: > { %s658_s27 = sadd.s32 4294967295, %s899_s26   ;;  %s659_s28 = sadd.s32 4294967294, %s899_s26   ;;  %s899_s26 = sphi %s948_s26, %s25_s26   ;;  %s895_s25 = sphi %s946_s25, %s1119_s25   ;;  %s891_s24 = sphi %s944_s24, %s1118_s24   ;;  %s887_s23 = sphi %s942_s23, %s1117_s23   ;;  %s883_s22 = sphi %s940_s22, %s1116_s22   ;;  %s879_s21 = sphi %s938_s21, %s1115_s21  }
   0xb   : > { %s37_s29 = sadd.s32 1, %s895_s25  ;;  %s44_s30 = sadd.s32 1, %s887_s23 }
   0xc   : > { %p39_p0 = scmp.ge.s32.totalorder %s37_s29, 2  ;;  %p51_p1 = scmp.ne.s32.totalorder %s887_s23, %s883_s22 }
   0xd   : > { %p52_p2 = scmp.eq.s32.totalorder %s899_s26, 0  ;;  %p57_p3 = scmp.ne.s32.totalorder %s883_s22, %s879_s21 }
   0xe   : > { %s1121_s29 = smov (%p39_p0, %s37_s29), 0  ;;  %p58_p5 = scmp.eq.s32.totalorder %s658_s27, 0 }
   0xf   : > { %1107 = sst [smem:[#allocation11_spill]] %s1121_s29  ;;  %p979_p4 = por %p52_p2, %p51_p1 }
  0x10   : > { %s41_s8 = ssub.s32 %s895_s25, %s1121_s29  ;;  %p215_p6 = scmp.eq.s32.totalorder %s658_s27, 1 }
  0x11   : > { %p42_p7 = scmp.eq.s32.totalorder %s41_s8, 0  ;;  %p985_p8 = por %p58_p5, %p57_p3 }
  0x12   : > { %p989_p9 = por %p215_p6, %p51_p1  ;;  %p221_p10 = scmp.eq.s32.totalorder %s659_s28, 1 }
  0x13   : > { %s994_s11 = scalar_select %p42_p7, %s887_s23, %s44_s30  }
  0x14   : > { %p996_p11 = por %p221_p10, %p57_p3  ;;  %p665_p12 = scmp.ge.s32.totalorder %s899_s26, 2 }
  0x15   : > { %p696_p13 = scmp.lt.s32.totalorder %s899_s26, 2  ;;  %s269_s13 = sand.u32 1, %s887_s23  }
  0x16   : > { %s1112_s0 = sld [smem:[#allocation12_spill]]  ;;  %s272_s17 = scalar_lea.vmem [#allocation2], %s269_s13 }
  0x17   : > { %s279_s18 = sshll.u32 %s272_s17, 4  ;;  %p1009_p0 = pnand %p696_p13, %p979_p4  ;;  %s280_s18 = int_to_ptr.vmem [resolvable:$true] %s279_s18 }
  0x18   : > { %p669_p1 = scmp.ge.s32.totalorder %s899_s26, 1  ;;  %p306_p2 = scmp.lt.s32.totalorder %s899_s26, 3 }
  0x19   : > { %s270_s27 = scalar_lea.sflag [#allocation3], %s269_s13  ;;  %s666_s28 = sshll.u32 %s269_s13, 3 }
  0x1a   : > { %p307_p3 = pnand %p669_p1, %p306_p2  ;;  %s677_s30 = sshll.u32 %s895_s25, 3 }
  0x1b   : > { %s297_s15 = scalar_lea.hbm %s1103_s5, %s677_s30  ;;  %s1024_s29 = sand.u32 (!%p307_p3), 1, %s883_s22  }
  0x1c   : > { %s275_s16 = scalar_lea.hbm %s1112_s0, %s895_s25  ;;  %s299_s17 = sshll.u32 %s297_s15, 4  ;;  %s300_s17 = int_to_ptr.hbm [resolvable:$true] %s299_s17 }
  0x1d   : > { %s277_s19 = sshll.u32 %s275_s16, 4  ;;  %s290_s16 = scalar_lea.vmem [#allocation5], %s666_s28  ;;  %s278_s19 = int_to_ptr.hbm [resolvable:$true] %s277_s19 }
  0x1e   : > { %688 = dma.hbm_to_vmem [thread:$0]  (!%p1009_p0), %s278_s19, 16, %s280_s18, %s270_s27  }
  0x1f   : > { %s301_s7 = sshll.u32 %s290_s16, 4  ;;  %s287_s0 = scalar_lea.sflag [#allocation6], %s269_s13  ;;  %s302_s7 = int_to_ptr.vmem [resolvable:$true] %s301_s7 }
  0x20   : > { %691 = dma.hbm_to_vmem [thread:$0]  (!%p1009_p0), %s300_s17, 128, %s302_s7, %s287_s0  }
  0x21   : > { %310 = sbr.rel (%p307_p3) target bundleno = 312 (0x138), region = 44  ;;  %s313_s18 = scalar_lea.sflag (!%p307_p3), [#allocation3], %s1024_s29 }
  0x22   : > { %s315_s19 = scalar_lea.vmem (!%p307_p3), [#allocation2], %s1024_s29 }
  0x26   : > { %866 = dma.done.wait (%p985_p8), %s313_s18, 16  }
  0x27   : > { %868 = vsyncadd (%p985_p8), %s313_s18, 4294967280  ;;  %s670_s13 = sshll.u32 %s1024_s29, 3  ;;  %s322_s0 = scalar_lea.sflag [#allocation6], %s1024_s29 }
  0x28   : > { %s325_s20 = scalar_lea.vmem [#allocation5], %s670_s13 }
  0x29   : > { %870 = dma.done.wait (%p985_p8), %s322_s0, 128  }
  0x2a   : > { %872 = vsyncadd (%p985_p8), %s322_s0, 4294967168  ;;  %v1040_v0 = vld [vmem:[%s325_s20] sm:$0xff]  ;;  %v392_v1 = vld [vmem:[%s1099_s1] sm:$0xf]  ;;  %vm398_vm0 = vcmask 519168   ;;  %vm417_vm1 = vcmask 1043456  }
  0x2b   : > { %412 = vst [vmem:[#allocation1] ss:$2 sm:$0xff] %v1040_v0  ;;  %v750_v2 = vld [vmem:[%s315_s19] ss:$0 sm:$0xff]  ;;  %v424_v5 = vmul.f32 %v1040_v0, %v1040_v0  ;;  %v901_v19 = vmov 0   ;;  %s678_s7 = sshll.u32 %s891_s24, 3 }
  0x2c   : > { %v397_v3 = vmul.f32 %v750_v2, %v392_v1  ;;  %v393_v4 = vld [vmem:[%s1101_s3] sm:$0xf]  ;;  %748 = vset.pattern.permute.xlu2 %v901_v19  ;;  %749 = vset.pattern.permute.xlu0 %v901_v19  ;;  %v902_v45 = vmov 839922192   ;;  %s490_s19 = scalar_lea.hbm %s1104_s6, %s678_s7  ;;  %s374_s0 = scalar_lea.vmem [#allocation7], %s670_s13 }
  0x2d   : > { %v404_v7 = vmul.f32 %v750_v2, %v393_v4  ;;  %v402_v30 = vld [vmem:[%s1100_s2] sm:$0xf]  ;;  %v460_v46 = vunpack.c.l.s4 %v902_v45  ;;  %s492_s20 = sshll.u32 %s374_s0, 4  ;;  %s494_s27 = sshll.u32 %s490_s19, 4  ;;  %s493_s20 = int_to_ptr.vmem [resolvable:$true] %s492_s20  ;;  %s495_s27 = int_to_ptr.hbm [resolvable:$true] %s494_s27 }
  0x2e   : > { %v399_v6 = vsel %vm398_vm0, %v397_v3, 0.0  ;;  %v408_v40 = vld [vmem:[%s1102_s4] sm:$0xf]  ;;  %s477_s28 = scalar_lea.sflag [#allocation4], %s1024_s29  ;;  %s827_s24 = sshra.s32 %s495_s27, 4  ;;  %s828_s24 = int_to_ptr.hbm [resolvable:$true] %s827_s24 }
  0x2f   : > { %400 = vadd.xlane.f32.xlu1 %v399_v6  ;;  %v405_v13 = vsel %vm398_vm0, %v404_v7, 0.0  ;;  %v461_v48 = vunpack.c.0.s8 %v460_v46  ;;  %s829_s30 = scalar_lea.hbm %s828_s24, 8  ;;  %s833_s13 = scalar_lea.hbm %s1104_s6, 16 }
  0x30   : > { %p830_p4 = scmp.ne.s32.totalorder %s828_s24, %s829_s30  ;;  %p834_p7 = scmp.lt.s32.totalorder %s828_s24, %s1104_s6 }
  0x31   : > { %p835_p8 = scmp.lt.s32.totalorder %s833_s13, %s829_s30 }
  0x32   : > { %v413_v8 = vld.sshfl [vmem:[#allocation1] sm:$0xff pattern:$0x75316420]  ;;  %v414_v9 = vld.sshfl [vmem:[#allocation1 + $0x8] sm:$0xff pattern:$0x75316420]  ;;  %p831_p5 = pnand %p830_p4, %p989_p9 }
  0x33   : > { %v418_v10 = vsel %vm417_vm1, %v413_v8, 0.0  ;;  %v419_v11 = vsel %vm417_vm1, %v414_v9, 0.0  ;;  %426 = vst [vmem:[#allocation1] ss:$2 sm:$0xff] %v424_v5  ;;  %p836_p10 = por %p835_p8, %p834_p7 }
  0x34   : > { %v420_v12 = vadd.f32 %v419_v11, %v418_v10  ;;  %p832_p6 = pneg %p831_p5 }
  0x36   : > { %421 = vadd.xlane.f32.xlu0 %v420_v12  ;;  %p837_p13 = pnand %p836_p10, %p832_p6 }
  0x37   : > { %406 = vadd.xlane.f32.xlu1 %v405_v13 }
  0x3a   : > { %v427_v14 = vld.sshfl [vmem:[#allocation1] sm:$0xff pattern:$0x75316420]  ;;  %v428_v15 = vld.sshfl [vmem:[#allocation1 + $0x8] sm:$0xff pattern:$0x75316420] }
  0x3b   : > { %v431_v16 = vsel %vm417_vm1, %v427_v14, 0.0  ;;  %v432_v17 = vsel %vm417_vm1, %v428_v15, 0.0 }
  0x3c   : > { %v433_v18 = vadd.f32 %v432_v17, %v431_v16 }
  0x3e   : > { %434 = vadd.xlane.f32.xlu0 %v433_v18 }
  0xa2   : > { %v401_v32 = vpop.xlane.xlu1 %400 }
  0xa3   : > { %v403_v33 = vadd.f32 %v402_v30, %v401_v32 }
  0xa5   : > { %v451_v36 = vadd.f32 1.0, %v403_v33 }
  0xa9   : > { %v422_v20 = vpop.xlane.xlu0 %421 }
  0xaa   : > { %v423_v21 = vmul.f32 0.00390625, %v422_v20  ;;  %v407_v41 = vpop.xlane.xlu1 %406 }
  0xab   : > { %v409_v42 = vadd.f32 %v408_v40, %v407_v41 }
  0xac   : > { %v437_v23 = vmul.f32 %v423_v21, %v423_v21 }
  0xb1   : > { %v435_v22 = vpop.xlane.xlu0 %434 }
  0xb2   : > { %v436_v24 = vmul.f32 0.00390625, %v435_v22 }
  0xb4   : > { %v438_v25 = vsub.f32 %v436_v24, %v437_v23 }
  0xb6   : > { %v439_v26 = vmax.f32 %v438_v25, 0.0 }
  0xb8   : > { %v440_v27 = vadd.f32 1e-05, %v439_v26 }
  0xba   : > { %751 = vrsqrt.f32 %v440_v27  ;;  %vm447_vm3 = vweird.f32 %v440_v27 }
  0xc0   : > { %v752_v28 = vpop.eup %751 }
  0xc1   : > { %v442_v29 = vmul.f32 %v752_v28, %v440_v27  ;;  %vm448_vm2 = vweird.f32 %v752_v28 }
  0xc2   : > { %vm449_vm4 = vmor %vm447_vm3, %vm448_vm2 }
  0xc3   : > { %v443_v31 = vmul.f32 %v752_v28, %v442_v29 }
  0xc5   : > { %v444_v34 = vmul.f32 0.5, %v443_v31 }
  0xc7   : > { %v445_v35 = vsub.f32 1.5, %v444_v34 }
  0xc9   : > { %v446_v37 = vmul.f32 %v752_v28, %v445_v35 }
  0xcb   : > { %v450_v38 = vsel %vm449_vm4, %v752_v28, %v446_v37 }
  0xcc   : > { %v452_v39 = vmul.f32 %v451_v36, %v450_v38 }
  0xce   : > { %457 = vperm.xlu2 %748, %v452_v39   ;;  %v453_v43 = vmul.f32 %v452_v39, %v423_v21 }
  0xd0   : > { %v454_v44 = vsub.f32 %v409_v42, %v453_v43 }
  0xd6   : > { %467 = vperm.xlu2 %748, %v454_v44  }
 0x128   : > { %v458_v47 = vpop.permute.xlu2 %457 }
 0x129   : > { %v462_v49 = vperm.slane %v458_v47, %v461_v48 }
 0x12b   : > { %v464_v51 = vmul.f32 %v462_v49, %v1040_v0 }
 0x130   : > { %v468_v50 = vpop.permute.xlu2 %467 }
 0x131   : > { %v472_v52 = vperm.slane %v468_v50, %v461_v48 }
 0x133   : > { %v474_v53 = vadd.f32 %v472_v52, %v464_v51 }
 0x135   : > { %475 = vst [vmem:[%s374_s0] sm:$0xff] %v474_v53 }
 0x136   : > { %840 = shalt.err (!%p837_p13)
}
 0x137   : > { %683 = dma.vmem_to_hbm [thread:$0]  (%p989_p9), %s493_s20, 128, %s495_s27, %s477_s28  }
 0x138 PF: > { %s506_s29 = sand.u32 1, %s879_s21   ;;  %p693_p0 = pnand %p665_p12, %p996_p11 }
 0x139   : > { %s507_s16 = scalar_lea.sflag [#allocation4], %s506_s29 }
 0x13a   : > { %p694_p1 = pneg %p693_p0 }
 0x13c   : > { %874 = dma.done.wait (%p694_p1), %s507_s16, 128  }
 0x13d   : > { %876 = vsyncadd (%p694_p1), %s507_s16, 4294967168  ;;  %s25_s26 = sadd.s32 1, %s899_s26   ;;  %s1114_s10 = sld [smem:[#allocation11_spill]] }
 0x13e   : > { %p22_p2 = scmp.ge.s32.totalorder %s25_s26, 4   ;;  %s1115_s21 = smov %s883_s22 }
 0x13f   : > { %s1116_s22 = smov %s887_s23  ;;  %s1117_s23 = smov %s994_s11 }
 0x140   : > { %s1118_s24 = smov %s895_s25  ;;  %24 = sbr.rel (!%p22_p2) target bundleno = 10 (0xa), region = 114 }
 0x143   : > { %s1119_s25 = smov %s1114_s10 }
 0x145   :  { %513 = vsyncpa [#allocation3], 1 }
 0x146   :  { %515 = vsyncpa [#allocation3 + $0x1], 1 }
 0x147   :  { %516 = vsyncpa [#allocation6], 1 }
 0x148   :  { %518 = vsyncpa [#allocation6 + $0x1], 1 }
 0x149   :  { %519 = vsyncpa [#allocation4], 1 }
 0x14a   :  { %521 = vsyncpa [#allocation4 + $0x1], 1 }

</bundles_post_ra>
